<compile_context>
chip_gen: v7x
topology: tpu7x:2x2x1
jax: 0.10.0
libtpu: 0.0.40
codegen_flags: <defaults>
</compile_context>

<pallas_src>
import jax
import jax.numpy as jnp
from jax import lax
from jax.experimental import pallas as pl
from jax.experimental.pallas import tpu as pltpu


def _round_up(n, m):
    return ((n + m - 1) // m) * m


# ~8 MiB of x per grid step: DMA time per tile (2-10 us across v5e/v6e/v7x)
# dwarfs the ~0.35 us per-step overhead, so we sit near the HBM roofline.
_TARGET_X_TILE_BYTES = 8 << 20


def mlp_kernel(x_ref, w1t_ref, b1_ref, w2t_ref, b2_ref, w3_ref, b3_ref, o_ref):
    # Whole 3-layer MLP for one batch tile.  w1t/w2t are pre-transposed in the
    # wrapper so both hidden-layer matmuls are canonical (M,K)x(K,N).
    x = x_ref[...]                                                     # (TB, D)

    h1 = jnp.dot(x, w1t_ref[...], preferred_element_type=jnp.float32) + b1_ref[...]
    h1 = jnp.maximum(h1, 0.0)                                          # (TB, 16)

    h2 = jnp.dot(h1, w2t_ref[...], preferred_element_type=jnp.float32) + b2_ref[...]
    h2 = jnp.maximum(h2, 0.0)                                          # (TB, 8)

    # w3 @ h2^T -> (1, TB): lane-dense row, so the output store is unmasked.
    out = lax.dot_general(w3_ref[...], h2, (((1,), (1,)), ((), ())),
                          preferred_element_type=jnp.float32) + b3_ref[...]
    o_ref[0] = out.astype(o_ref.dtype)                                 # (1, TB)


def my_model_forward(x, params, *, batch_tile=None):
    """x: (B, D). params in PyTorch layout ((out,in) weights, (out,) biases).
    Returns (B,) float32, matching torch's squeeze(1)."""
    B, D = x.shape
    w1, b1, w2, b2, w3, b3 = params

    # ---- batch-tile selection: byte-targeted, 128-row multiples ------------
    if batch_tile is None:
        row_bytes = D * x.dtype.itemsize
        bt = max((_TARGET_X_TILE_BYTES // row_bytes) // 128 * 128, 128)
        bt = min(bt, _round_up(B, 128))
        if B > 256:
            # keep >= 2 grid steps so the "parallel" batch axis can shard
            # across v7x's two TensorCores (no-op on v5e/v6e).
            bt = min(bt, _round_up(pl.cdiv(B, 2), 128))
        batch_tile = int(bt)
    assert batch_tile % 128 == 0, "batch_tile must be a multiple of 128 (lanes)"

    # Tiny batches (B < batch_tile): pad rows once (negligible bytes) so the
    # single block stays within the array.  Large ragged batches use a cdiv
    # grid with a partial boundary block instead of a full-copy jnp.pad of x;
    # the boundary block's undefined rows are sliced off below and rows are
    # independent, so they cannot contaminate valid outputs.
    if B < batch_tile:
        x = jnp.pad(x, ((0, batch_tile - B), (0, 0)))
    num_tiles = pl.cdiv(x.shape[0], batch_tile)

    # One-time host-side relayout of the resident weights; biases as (1, out).
    w1t = w1.T                      # (D, 16)
    w2t = w2.T                      # (16, 8)
    b1_2d = b1.reshape(1, -1)
    b2_2d = b2.reshape(1, -1)
    b3_2d = b3.reshape(1, -1)

    # Constant index maps keep weights/biases resident across grid steps.
    const2d = lambda arr: pl.BlockSpec(arr.shape, lambda i: (0, 0))

    out = pl.pallas_call(
        mlp_kernel,
        out_shape=jax.ShapeDtypeStruct((num_tiles, 1, batch_tile), jnp.float32),
        grid_spec=pltpu.PrefetchScalarGridSpec(
            num_scalar_prefetch=0,
            grid=(num_tiles,),
            in_specs=[
                pl.BlockSpec((batch_tile, D), lambda i: (i, 0)),  # x: pipelined
                const2d(w1t), const2d(b1_2d),
                const2d(w2t), const2d(b2_2d),
                const2d(w3), const2d(b3_2d),
            ],
            out_specs=pl.BlockSpec((1, 1, batch_tile), lambda i: (i, 0, 0)),
        ),
        compiler_params=pltpu.CompilerParams(
            dimension_semantics=("parallel",),     # megacore split on v7x
            vmem_limit_bytes=48 * 1024 * 1024,     # safe on v5e/v6e/v7x
        ),
    )(x, w1t, b1_2d, w2t, b2_2d, w3, b3_2d)

    return out.reshape(-1)[:B]                     # squeeze(1) -> (B,)


def init_params(key, input_dim):
    """Deterministic params with the same shapes/init style as the PyTorch module."""
    ks = jax.random.split(key, 6)

    def linear(kw, kb, fan_in, fan_out):
        bound = 1.0 / jnp.sqrt(fan_in)
        w = jax.random.uniform(kw, (fan_out, fan_in), jnp.float32, -bound, bound)
        b = jax.random.uniform(kb, (fan_out,), jnp.float32, -bound, bound)
        return w, b

    w1, b1 = linear(ks[0], ks[1], input_dim, 16)
    w2, b2 = linear(ks[2], ks[3], 16, 8)
    w3, b3 = linear(ks[4], ks[5], 8, 1)
    return (w1, b1, w2, b2, w3, b3)


def reference_forward(x, params):
    w1, b1, w2, b2, w3, b3 = params
    h = jnp.maximum(x @ w1.T + b1, 0.0)
    h = jnp.maximum(h @ w2.T + b2, 0.0)
    return (h @ w3.T + b3)[:, 0]


if __name__ == "__main__":
    key = jax.random.PRNGKey(0)
    k_x, k_p, k_x2, k_p2 = jax.random.split(key, 4)

    # Small demo consistent with the module: batch=8, input_dim=32
    # (tiny-batch path: pads rows to one 128-row tile).
    B, INPUT_DIM = 8, 32
    x = jax.random.normal(k_x, (B, INPUT_DIM), jnp.float32)
    params = init_params(k_p, INPUT_DIM)

    y = jax.block_until_ready(my_model_forward(x, params))
    y_ref = reference_forward(x, params)
    assert y.shape == (B,)
    assert jnp.allclose(y, y_ref, atol=1e-5, rtol=1e-5)

    # Ragged multi-tile path: cdiv grid with a partial boundary block, no x pad.
    B2, D2 = 300, 64
    x2 = jax.random.normal(k_x2, (B2, D2), jnp.float32)
    params2 = init_params(k_p2, D2)
    y2 = jax.block_until_ready(my_model_forward(x2, params2))
    y2_ref = reference_forward(x2, params2)
    assert y2.shape == (B2,)
    assert jnp.allclose(y2, y2_ref, atol=1e-4, rtol=1e-4)

    print("KERNEL_OK")
</pallas_src>

<mosaic_0001>
module attributes {stable_mosaic.version = 11 : i64} {
  func.func @mlp_kernel(%arg0: i32, %arg1: memref<128x32xf32, #tpu.memory_space<vmem>>, %arg2: memref<32x16xf32, #tpu.memory_space<vmem>>, %arg3: memref<1x16xf32, #tpu.memory_space<vmem>>, %arg4: memref<16x8xf32, #tpu.memory_space<vmem>>, %arg5: memref<1x8xf32, #tpu.memory_space<vmem>>, %arg6: memref<1x8xf32, #tpu.memory_space<vmem>>, %arg7: memref<1x1xf32, #tpu.memory_space<vmem>>, %arg8: memref<1x1x128xf32, #tpu.memory_space<vmem>>) attributes {dimension_semantics = [#tpu.dimension_semantics<parallel>], iteration_bounds = array<i64: 1>, scalar_prefetch = 0 : i64, scratch_operands = 0 : i64, tpu.core_type = #tpu.core_type<tc>, window_params = [{transform_indices = @transform_0, window_bounds = array<i64: 128, 32>}, {pipeline_mode = #tpu.pipeline_mode<synchronous>, transform_indices = @transform_1, window_bounds = array<i64: 32, 16>}, {pipeline_mode = #tpu.pipeline_mode<synchronous>, transform_indices = @transform_2, window_bounds = array<i64: 1, 16>}, {pipeline_mode = #tpu.pipeline_mode<synchronous>, transform_indices = @transform_3, window_bounds = array<i64: 16, 8>}, {pipeline_mode = #tpu.pipeline_mode<synchronous>, transform_indices = @transform_4, window_bounds = array<i64: 1, 8>}, {pipeline_mode = #tpu.pipeline_mode<synchronous>, transform_indices = @transform_5, window_bounds = array<i64: 1, 8>}, {pipeline_mode = #tpu.pipeline_mode<synchronous>, transform_indices = @transform_6, window_bounds = array<i64: 1, 1>}, {transform_indices = @transform_7, window_bounds = array<i64: 1, 1, 128>}]} {
    %c0 = arith.constant 0 : index
    %c0_0 = arith.constant 0 : index
    %0 = vector.load %arg1[%c0, %c0_0] : memref<128x32xf32, #tpu.memory_space<vmem>>, vector<128x32xf32>
    %c0_1 = arith.constant 0 : index
    %c0_2 = arith.constant 0 : index
    %1 = vector.load %arg2[%c0_1, %c0_2] : memref<32x16xf32, #tpu.memory_space<vmem>>, vector<32x16xf32>
    %cst = arith.constant dense<0.000000e+00> : vector<128x16xf32>
    %2 = tpu.matmul %0, %1, %cst {dimension_numbers = #tpu.dot_dimension_numbers<[1], [0], [0], [1], [0, 0, 1, 1], [], []>} : vector<128x32xf32>, vector<32x16xf32>, vector<128x16xf32> -> vector<128x16xf32>
    %c0_3 = arith.constant 0 : index
    %c0_4 = arith.constant 0 : index
    %3 = vector.load %arg3[%c0_3, %c0_4] : memref<1x16xf32, #tpu.memory_space<vmem>>, vector<1x16xf32>
    %4 = vector.broadcast %3 : vector<1x16xf32> to vector<128x16xf32>
    %5 = arith.addf %2, %4 : vector<128x16xf32>
    %cst_5 = arith.constant 0.000000e+00 : f32
    %6 = vector.broadcast %cst_5 : f32 to vector<128x16xf32>
    %7 = arith.maximumf %5, %6 : vector<128x16xf32>
    %c0_6 = arith.constant 0 : index
    %c0_7 = arith.constant 0 : index
    %8 = vector.load %arg4[%c0_6, %c0_7] : memref<16x8xf32, #tpu.memory_space<vmem>>, vector<16x8xf32>
    %cst_8 = arith.constant dense<0.000000e+00> : vector<128x8xf32>
    %9 = tpu.matmul %7, %8, %cst_8 {dimension_numbers = #tpu.dot_dimension_numbers<[1], [0], [0], [1], [0, 0, 1, 1], [], []>} : vector<128x16xf32>, vector<16x8xf32>, vector<128x8xf32> -> vector<128x8xf32>
    %c0_9 = arith.constant 0 : index
    %c0_10 = arith.constant 0 : index
    %10 = vector.load %arg5[%c0_9, %c0_10] : memref<1x8xf32, #tpu.memory_space<vmem>>, vector<1x8xf32>
    %11 = vector.broadcast %10 : vector<1x8xf32> to vector<128x8xf32>
    %12 = arith.addf %9, %11 : vector<128x8xf32>
    %cst_11 = arith.constant 0.000000e+00 : f32
    %13 = vector.broadcast %cst_11 : f32 to vector<128x8xf32>
    %14 = arith.maximumf %12, %13 : vector<128x8xf32>
    %c0_12 = arith.constant 0 : index
    %c0_13 = arith.constant 0 : index
    %15 = vector.load %arg6[%c0_12, %c0_13] : memref<1x8xf32, #tpu.memory_space<vmem>>, vector<1x8xf32>
    %cst_14 = arith.constant dense<0.000000e+00> : vector<1x128xf32>
    %16 = tpu.matmul %15, %14, %cst_14 {dimension_numbers = #tpu.dot_dimension_numbers<[1], [1], [0], [0], [0, 0, 1, 0], [], []>} : vector<1x8xf32>, vector<128x8xf32>, vector<1x128xf32> -> vector<1x128xf32>
    %c0_15 = arith.constant 0 : index
    %c0_16 = arith.constant 0 : index
    %17 = vector.load %arg7[%c0_15, %c0_16] : memref<1x1xf32, #tpu.memory_space<vmem>>, vector<1x1xf32>
    %18 = vector.broadcast %17 : vector<1x1xf32> to vector<1x128xf32>
    %19 = arith.addf %16, %18 : vector<1x128xf32>
    %c0_17 = arith.constant 0 : index
    %c0_18 = arith.constant 0 : index
    %c0_19 = arith.constant 0 : index
    %20 = vector.load %arg8[%c0_17, %c0_18, %c0_19] : memref<1x1x128xf32, #tpu.memory_space<vmem>>, vector<1x1x128xf32>
    %21 = vector.shape_cast %20 : vector<1x1x128xf32> to vector<1x128xf32>
    %22 = vector.shape_cast %19 : vector<1x128xf32> to vector<1x1x128xf32>
    tpu.vector_store %arg8[%c0_17, %c0_18, %c0_19], %22 {strides = array<i32>} : memref<1x1x128xf32, #tpu.memory_space<vmem>>, vector<1x1x128xf32>,
    return
  }
  func.func @transform_0(%arg0: i32) -> (i32, i32) {
    %c0_i32 = arith.constant 0 : i32
    %c0_i32_0 = arith.constant 0 : i32
    return %arg0, %c0_i32 : i32, i32
  }
  func.func @transform_1(%arg0: i32) -> (i32, i32) {
    %c0_i32 = arith.constant 0 : i32
    %c0_i32_0 = arith.constant 0 : i32
    %c0_i32_1 = arith.constant 0 : i32
    return %c0_i32, %c0_i32_0 : i32, i32
  }
  func.func @transform_2(%arg0: i32) -> (i32, i32) {
    %c0_i32 = arith.constant 0 : i32
    %c0_i32_0 = arith.constant 0 : i32
    %c0_i32_1 = arith.constant 0 : i32
    return %c0_i32, %c0_i32_0 : i32, i32
  }
  func.func @transform_3(%arg0: i32) -> (i32, i32) {
    %c0_i32 = arith.constant 0 : i32
    %c0_i32_0 = arith.constant 0 : i32
    %c0_i32_1 = arith.constant 0 : i32
    return %c0_i32, %c0_i32_0 : i32, i32
  }
  func.func @transform_4(%arg0: i32) -> (i32, i32) {
    %c0_i32 = arith.constant 0 : i32
    %c0_i32_0 = arith.constant 0 : i32
    %c0_i32_1 = arith.constant 0 : i32
    return %c0_i32, %c0_i32_0 : i32, i32
  }
  func.func @transform_5(%arg0: i32) -> (i32, i32) {
    %c0_i32 = arith.constant 0 : i32
    %c0_i32_0 = arith.constant 0 : i32
    %c0_i32_1 = arith.constant 0 : i32
    return %c0_i32, %c0_i32_0 : i32, i32
  }
  func.func @transform_6(%arg0: i32) -> (i32, i32) {
    %c0_i32 = arith.constant 0 : i32
    %c0_i32_0 = arith.constant 0 : i32
    %c0_i32_1 = arith.constant 0 : i32
    return %c0_i32, %c0_i32_0 : i32, i32
  }
  func.func @transform_7(%arg0: i32) -> (i32, i32, i32) {
    %c0_i32 = arith.constant 0 : i32
    %c0_i32_0 = arith.constant 0 : i32
    %c0_i32_1 = arith.constant 0 : i32
    return %arg0, %c0_i32, %c0_i32_0 : i32, i32, i32
  }
}

</mosaic_0001>

<bundles_post_ra>
// kernel: tpu_custom_call.1
= control target key start
LH: loop header
LB: loop body
LE: loop exit
PB: predicated region body
PF: predicated region fallthrough
CT: control target
= control target key end

     0   :  { %s1106_s0 = inlined_call_operand.vmem [shape: f32[128,32], index: 0, kind: input, shape index: {}]   ;;  %s1107_s1 = inlined_call_operand.vmem [shape: f32[32,16], index: 1, kind: input, shape index: {}]   ;;  %s1108_s2 = inlined_call_operand.vmem [shape: f32[1,16], index: 2, kind: input, shape index: {}]   ;;  %s1109_s3 = inlined_call_operand.vmem [shape: f32[16,8], index: 3, kind: input, shape index: {}]   ;;  %s1110_s4 = inlined_call_operand.vmem [shape: f32[1,8], index: 4, kind: input, shape index: {}]   ;;  %s1111_s5 = inlined_call_operand.vmem [shape: f32[1,8], index: 5, kind: input, shape index: {}]   ;;  %s1112_s6 = inlined_call_operand.<no memory space> [shape: f32[1,1], index: 6, kind: input, shape index: {}]   ;;  %s1113_s7 = inlined_call_operand.hbm [shape: f32[1,1,128], index: 7, kind: output, shape index: {}]  }
   0x1   :  { %v12_v0 = vstv %s1112_s6 }
   0x2   :  { %13 = vst [vmem:[#allocation2] sm:$0x1] %v12_v0 }
   0x3   :  { %v45_v1 = vld [vmem:[%s1107_s1] sm:$0xff]  ;;  %v46_v2 = vld [vmem:[%s1107_s1 + $0x8] sm:$0xff]  ;;  %v47_v3 = vld [vmem:[%s1107_s1 + $0x10] sm:$0xff]  ;;  %vm56_vm0 = vcmask 261120  }
   0x4   :  { %v834_v4 = vpack.c.bf16 %v46_v2, %v45_v1  ;;  %v48_v5 = vld [vmem:[%s1107_s1 + $0x18] sm:$0xff]  ;;  %v29_v6 = vld [vmem:[%s1106_s0] sm:$0xff] }
   0x5   :  { %v838_v7 = vpack.c.bf16 %v48_v5, %v47_v3  ;;  %747 = vmatprep.mubr.msk.f32.mxu0 %vm56_vm0, %v29_v6 }
   0x6   :  { %835 = vmatprep.subr.bf16.mxu0 %v834_v4 }
   0x7   :  { %837 = vmatpush3.bf16.msra.mxu0 %v834_v4 }
   0x8   :  { %839 = vmatprep.subr.bf16.mxu0 %v838_v7 }
   0x9   :  { %14 = vsyncpa [#allocation4], 0  ;;  %v30_v8 = vld [vmem:[%s1106_s0 + $0x8] sm:$0xff]  ;;  %v31_v9 = vld [vmem:[%s1106_s0 + $0x10] sm:$0xff]  ;;  %vm275_vm1 = vcmask 130048   ;;  %vm909_vm2 = vmmov 0  }
   0xa   :  { %v32_v10 = vld [vmem:[%s1106_s0 + $0x18] sm:$0xff]  ;;  %v33_v11 = vld [vmem:[%s1106_s0 + $0x20] sm:$0xff]  ;;  %v34_v12 = vld [vmem:[%s1106_s0 + $0x28] sm:$0xff]  ;;  %vm496_vm3 = vcmask 64512   ;;  %s912_s22 = smov [#allocation3]  }
   0xb   :  { %841 = vmatpush3.bf16.msra.mxu0 %v838_v7  ;;  %v35_v13 = vld [vmem:[%s1106_s0 + $0x30] sm:$0xff]  ;;  %v36_v14 = vld [vmem:[%s1106_s0 + $0x38] sm:$0xff]  ;;  %v37_v15 = vld [vmem:[%s1106_s0 + $0x40] sm:$0xff]  ;;  %s625_s23 = sshll.u32 %s912_s22, 4  ;;  %s626_s23 = int_to_ptr.vmem [resolvable:$true] %s625_s23 }
   0xc   :  { %v38_v16 = vld [vmem:[%s1106_s0 + $0x48] sm:$0xff]  ;;  %v39_v17 = vld [vmem:[%s1106_s0 + $0x50] sm:$0xff]  ;;  %v40_v18 = vld [vmem:[%s1106_s0 + $0x58] sm:$0xff]  ;;  %s884_s24 = scalar_lea.vmem %s626_s23, 16  ;;  %s888_s25 = scalar_lea.vmem %s626_s23, 32 }
   0xd   :  { %v41_v19 = vld [vmem:[%s1106_s0 + $0x60] sm:$0xff]  ;;  %v42_v20 = vld [vmem:[%s1106_s0 + $0x68] sm:$0xff]  ;;  %v43_v21 = vld [vmem:[%s1106_s0 + $0x70] sm:$0xff]  ;;  %p885_p0 = scmp.ne.s32.totalorder %s626_s23, %s884_s24  ;;  %p889_p1 = scmp.lt.s32.totalorder %s626_s23, %s626_s23 }
   0xe   :  { %748 = vmatmul.mubr.msk.f32.vlgmr.msra.gmra.mrb[0].mxu0 %vm56_vm0, %v30_v8  ;;  %v44_v22 = vld [vmem:[%s1106_s0 + $0x78] sm:$0xff]  ;;  %v266_v23 = vld [vmem:[%s1109_s3] sm:$0xff]  ;;  %v267_v24 = vld [vmem:[%s1109_s3 + $0x8] sm:$0xff]  ;;  %p890_p2 = scmp.lt.s32.totalorder %s888_s25, %s884_s24 }
   0xf   :  { %750 = vmatprep.mubr.msk.f32.mxu0 %vm56_vm0, %v31_v9  ;;  %v842_v25 = vpack.c.bf16 %v267_v24, %v266_v23  ;;  %v633_v26 = vld [vmem:[%s1108_s2] ss:$0 sm:$0xff]  ;;  %vm1063_vm4 = vmpackc.low %vm496_vm3, %vm496_vm3 }
  0x10   :  { %p891_p3 = por %p890_p2, %p889_p1 }
  0x11   :  { %843 = vmatprep.subr.bf16.mxu1 %v842_v25 }
  0x12   :  { %751 = vmatmul.mubr.msk.f32.gmra.mrb[2].mxu0 %vm56_vm0, %v32_v10  ;;  %845 = vmatpush3.bf16.msra.mxu1 %v842_v25  ;;  %p892_p4 = pnand %p891_p3, %p885_p0 }
  0x13   :  { %753 = vmatprep.mubr.msk.f32.mxu0 %vm56_vm0, %v33_v11  ;;  %v908_v11 = vmov 0.0|0.0  }
  0x14   :  { %846 = vmatprep.subr.bf16.mxu1 %v908_v11 }
  0x16   :  { %754 = vmatmul.mubr.msk.f32.gmra.mrb[4].mxu0 %vm56_vm0, %v34_v12  ;;  %v910_v12 = vmov 0.0  }
  0x17   :  { %756 = vmatprep.mubr.msk.f32.mxu0 %vm56_vm0, %v35_v13  ;;  %v486_v13 = vld [vmem:[#allocation2] sm:$0x1] }
  0x1a   :  { %757 = vmatmul.mubr.msk.f32.gmra.mrb[6].mxu0 %vm56_vm0, %v36_v14  ;;  %v911_v14 = vmov 0  }
  0x1b   :  { %759 = vmatprep.mubr.msk.f32.mxu0 %vm56_vm0, %v37_v15  ;;  %883 = vset.pattern.permute.xlu0 %v911_v14  ;;  %v650_v15 = vld [vmem:[%s1110_s4] ss:$0 sm:$0xff] }
  0x1c   :  { %489 = vperm.xlu0 %883, %v486_v13  }
  0x1e   :  { %760 = vmatmul.mubr.msk.f32.gmra.mrb[8].mxu0 %vm56_vm0, %v38_v16 }
  0x1f   :  { %762 = vmatprep.mubr.msk.f32.mxu0 %vm56_vm0, %v39_v17 }
  0x22   :  { %763 = vmatmul.mubr.msk.f32.gmra.mrb[10].mxu0 %vm56_vm0, %v40_v18 }
  0x23   :  { %765 = vmatprep.mubr.msk.f32.mxu0 %vm56_vm0, %v41_v19 }
  0x26   :  { %766 = vmatmul.mubr.msk.f32.gmra.mrb[12].mxu0 %vm56_vm0, %v42_v20 }
  0x27   :  { %768 = vmatprep.mubr.msk.f32.mxu0 %vm56_vm0, %v43_v21 }
  0x2a   :  { %769 = vmatmul.mubr.msk.f32.gmra.mrb[14].mxu0 %vm56_vm0, %v44_v22 }
  0x9b   :  { %v490_v14 = vpop.permute.xlu0 %489 }
  0xe1   :  { %v749_v27 = vpop.f32.mrb[0].mxu0 }
  0xe2   :  { %v177_v28 = vadd.f32 %v749_v27, %v633_v26  ;;  %v171_v29 = vpop.f32.mrb[1].mxu0 }
  0xe3   :  { %v172_v30 = vadd.f32 %v633_v26, %v171_v29 }
  0xe4   :  { %v251_v33 = vmax.f32 %v177_v28, 0.0 }
  0xe5   :  { %v250_v31 = vmax.f32 %v172_v30, 0.0  ;;  %v752_v32 = vpop.f32.mrb[2].mxu0 }
  0xe6   :  { %v187_v34 = vadd.f32 %v752_v32, %v633_v26  ;;  %v181_v35 = vpop.f32.mrb[3].mxu0 }
  0xe7   :  { %v182_v36 = vadd.f32 %v633_v26, %v181_v35  ;;  %775 = vmatprep.mubr.msk.f32.mxu1 %vm275_vm1, %v250_v31 }
  0xe8   :  { %v253_v37 = vmax.f32 %v187_v34, 0.0  ;;  %776 = vmatmul.mubr.msk.f32.vlgmr.msra.gmra.mrb[0].mxu1 %vm275_vm1, %v251_v33 }
  0xe9   :  { %v252_v38 = vmax.f32 %v182_v36, 0.0  ;;  %v755_v39 = vpop.f32.mrb[4].mxu0 }
  0xea   :  { %v197_v40 = vadd.f32 %v755_v39, %v633_v26  ;;  %v191_v41 = vpop.f32.mrb[5].mxu0 }
  0xeb   :  { %778 = vmatprep.mubr.msk.f32.mxu1 %vm275_vm1, %v252_v38  ;;  %v192_v42 = vadd.f32 %v633_v26, %v191_v41 }
  0xec   :  { %779 = vmatmul.mubr.msk.f32.gmra.mrb[2].mxu1 %vm275_vm1, %v253_v37  ;;  %v255_v43 = vmax.f32 %v197_v40, 0.0 }
  0xed   :  { %v254_v44 = vmax.f32 %v192_v42, 0.0  ;;  %v758_v45 = vpop.f32.mrb[6].mxu0 }
  0xee   :  { %v207_v46 = vadd.f32 %v758_v45, %v633_v26  ;;  %v201_v47 = vpop.f32.mrb[7].mxu0 }
  0xef   :  { %781 = vmatprep.mubr.msk.f32.mxu1 %vm275_vm1, %v254_v44  ;;  %v202_v48 = vadd.f32 %v633_v26, %v201_v47 }
  0xf0   :  { %782 = vmatmul.mubr.msk.f32.gmra.mrb[4].mxu1 %vm275_vm1, %v255_v43  ;;  %v257_v49 = vmax.f32 %v207_v46, 0.0 }
  0xf1   :  { %v256_v50 = vmax.f32 %v202_v48, 0.0  ;;  %v761_v51 = vpop.f32.mrb[8].mxu0 }
  0xf2   :  { %v217_v52 = vadd.f32 %v761_v51, %v633_v26  ;;  %v211_v53 = vpop.f32.mrb[9].mxu0 }
  0xf3   :  { %784 = vmatprep.mubr.msk.f32.mxu1 %vm275_vm1, %v256_v50  ;;  %v212_v54 = vadd.f32 %v633_v26, %v211_v53 }
  0xf4   :  { %785 = vmatmul.mubr.msk.f32.gmra.mrb[6].mxu1 %vm275_vm1, %v257_v49  ;;  %v259_v55 = vmax.f32 %v217_v52, 0.0 }
  0xf5   :  { %v258_v56 = vmax.f32 %v212_v54, 0.0  ;;  %v764_v57 = vpop.f32.mrb[10].mxu0 }
  0xf6   :  { %v227_v58 = vadd.f32 %v764_v57, %v633_v26  ;;  %v221_v59 = vpop.f32.mrb[11].mxu0 }
  0xf7   :  { %787 = vmatprep.mubr.msk.f32.mxu1 %vm275_vm1, %v258_v56  ;;  %v222_v60 = vadd.f32 %v633_v26, %v221_v59 }
  0xf8   :  { %788 = vmatmul.mubr.msk.f32.gmra.mrb[8].mxu1 %vm275_vm1, %v259_v55  ;;  %v261_v61 = vmax.f32 %v227_v58, 0.0 }
  0xf9   :  { %v260_v62 = vmax.f32 %v222_v60, 0.0  ;;  %v767_v63 = vpop.f32.mrb[12].mxu0 }
  0xfa   :  { %v237_v0 = vadd.f32 %v767_v63, %v633_v26  ;;  %v231_v1 = vpop.f32.mrb[13].mxu0 }
  0xfb   :  { %790 = vmatprep.mubr.msk.f32.mxu1 %vm275_vm1, %v260_v62  ;;  %v232_v2 = vadd.f32 %v633_v26, %v231_v1 }
  0xfc   :  { %791 = vmatmul.mubr.msk.f32.gmra.mrb[10].mxu1 %vm275_vm1, %v261_v61  ;;  %v263_v3 = vmax.f32 %v237_v0, 0.0 }
  0xfd   :  { %v262_v4 = vmax.f32 %v232_v2, 0.0  ;;  %v770_v5 = vpop.f32.mrb[14].mxu0 }
  0xfe   :  { %v247_v6 = vadd.f32 %v770_v5, %v633_v26  ;;  %v241_v7 = vpop.f32.mrb[15].mxu0 }
  0xff   :  { %793 = vmatprep.mubr.msk.f32.mxu1 %vm275_vm1, %v262_v4  ;;  %v242_v8 = vadd.f32 %v633_v26, %v241_v7 }
 0x100   :  { %794 = vmatmul.mubr.msk.f32.gmra.mrb[12].mxu1 %vm275_vm1, %v263_v3  ;;  %v265_v9 = vmax.f32 %v247_v6, 0.0 }
 0x101   :  { %v264_v10 = vmax.f32 %v242_v8, 0.0 }
 0x103   :  { %796 = vmatprep.mubr.msk.f32.mxu1 %vm275_vm1, %v264_v10  ;;  %v492_v10 = vlaneseq }
 0x104   :  { %797 = vmatmul.mubr.msk.f32.gmra.mrb[14].mxu1 %vm275_vm1, %v265_v9  ;;  %v485_v9 = vld [vmem:[%s1111_s5] sm:$0x1] }
 0x105   :  { %831 = vmatprep.mubr.msk.f32.mxu1 %vm909_vm2, %v910_v12  ;;  %v493_v12 = vshrl.u32 %v492_v10, 7 }
 0x107   :  { %v494_v13 = vsub.s32 0, %v493_v12 }
 0x1bb   :  { %v777_v16 = vpop.f32.mrb[0].mxu1 }
 0x1bc   :  { %v396_v17 = vadd.f32 %v777_v16, %v650_v15  ;;  %v390_v18 = vpop.f32.mrb[1].mxu1 }
 0x1bd   :  { %v391_v19 = vadd.f32 %v650_v15, %v390_v18 }
 0x1be   :  { %v470_v20 = vmax.f32 %v396_v17, 0.0 }
 0x1bf   :  { %v469_v21 = vmax.f32 %v391_v19, 0.0  ;;  %v780_v22 = vpop.f32.mrb[2].mxu1 }
 0x1c0   :  { %v406_v23 = vadd.f32 %v780_v22, %v650_v15  ;;  %v400_v24 = vpop.f32.mrb[3].mxu1 }
 0x1c1   :  { %v847_v26 = vpack.c.bf16 %v470_v20, %v469_v21  ;;  %v401_v27 = vadd.f32 %v650_v15, %v400_v24 }
 0x1c2   :  { %v472_v28 = vmax.f32 %v406_v23, 0.0 }
 0x1c3   :  { %v471_v29 = vmax.f32 %v401_v27, 0.0  ;;  %849 = vmatpush3.bf16.xpose.msk.msra.mxu1 %vm1063_vm4, %v847_v26  ;;  %v783_v30 = vpop.f32.mrb[4].mxu1 }
 0x1c4   :  { %v416_v31 = vadd.f32 %v783_v30, %v650_v15  ;;  %v410_v32 = vpop.f32.mrb[5].mxu1  ;;  %850 = vmatprep.subr.bf16.mxu1 %v908_v11 }
 0x1c5   :  { %v851_v33 = vpack.c.bf16 %v472_v28, %v471_v29  ;;  %v411_v34 = vadd.f32 %v650_v15, %v410_v32 }
 0x1c6   :  { %v474_v35 = vmax.f32 %v416_v31, 0.0 }
 0x1c7   :  { %v473_v36 = vmax.f32 %v411_v34, 0.0  ;;  %v786_v37 = vpop.f32.mrb[6].mxu1 }
 0x1c8   :  { %v426_v38 = vadd.f32 %v786_v37, %v650_v15  ;;  %v420_v39 = vpop.f32.mrb[7].mxu1 }
 0x1c9   :  { %v855_v40 = vpack.c.bf16 %v474_v35, %v473_v36  ;;  %v421_v41 = vadd.f32 %v650_v15, %v420_v39 }
 0x1ca   :  { %v476_v42 = vmax.f32 %v426_v38, 0.0 }
 0x1cb   :  { %853 = vmatpush3.bf16.xpose.msk.msra.mxu1 %vm1063_vm4, %v851_v33  ;;  %v475_v43 = vmax.f32 %v421_v41, 0.0  ;;  %v789_v44 = vpop.f32.mrb[8].mxu1 }
 0x1cc   :  { %854 = vmatprep.subr.bf16.mxu1 %v908_v11  ;;  %v436_v45 = vadd.f32 %v789_v44, %v650_v15  ;;  %v430_v46 = vpop.f32.mrb[9].mxu1 }
 0x1cd   :  { %v859_v47 = vpack.c.bf16 %v476_v42, %v475_v43  ;;  %v431_v48 = vadd.f32 %v650_v15, %v430_v46 }
 0x1ce   :  { %v478_v49 = vmax.f32 %v436_v45, 0.0 }
 0x1cf   :  { %v477_v50 = vmax.f32 %v431_v48, 0.0  ;;  %v792_v51 = vpop.f32.mrb[10].mxu1 }
 0x1d0   :  { %v446_v52 = vadd.f32 %v792_v51, %v650_v15  ;;  %v440_v53 = vpop.f32.mrb[11].mxu1 }
 0x1d1   :  { %v863_v54 = vpack.c.bf16 %v478_v49, %v477_v50  ;;  %v441_v55 = vadd.f32 %v650_v15, %v440_v53 }
 0x1d2   :  { %v480_v56 = vmax.f32 %v446_v52, 0.0 }
 0x1d3   :  { %857 = vmatpush3.bf16.xpose.msk.msra.mxu1 %vm1063_vm4, %v855_v40  ;;  %v479_v57 = vmax.f32 %v441_v55, 0.0  ;;  %v795_v58 = vpop.f32.mrb[12].mxu1 }
 0x1d4   :  { %858 = vmatprep.subr.bf16.mxu1 %v908_v11  ;;  %v456_v59 = vadd.f32 %v795_v58, %v650_v15  ;;  %v450_v60 = vpop.f32.mrb[13].mxu1 }
 0x1d5   :  { %v867_v61 = vpack.c.bf16 %v480_v56, %v479_v57  ;;  %v451_v62 = vadd.f32 %v650_v15, %v450_v60 }
 0x1d6   :  { %v482_v63 = vmax.f32 %v456_v59, 0.0 }
 0x1d7   :  { %v481_v0 = vmax.f32 %v451_v62, 0.0  ;;  %v798_v1 = vpop.f32.mrb[14].mxu1 }
 0x1d8   :  { %v466_v2 = vadd.f32 %v798_v1, %v650_v15  ;;  %v460_v3 = vpop.f32.mrb[15].mxu1 }
 0x1d9   :  { %v871_v4 = vpack.c.bf16 %v482_v63, %v481_v0  ;;  %v461_v5 = vadd.f32 %v650_v15, %v460_v3  ;;  %v495_v15 = vrot.slane %v490_v14, %v494_v13 }
 0x1da   :  { %v484_v6 = vmax.f32 %v466_v2, 0.0 }
 0x1db   :  { %861 = vmatpush3.bf16.xpose.msk.msra.mxu1 %vm1063_vm4, %v859_v47  ;;  %v483_v7 = vmax.f32 %v461_v5, 0.0 }
 0x1dc   :  { %862 = vmatprep.subr.bf16.mxu1 %v908_v11 }
 0x1dd   :  { %v875_v8 = vpack.c.bf16 %v484_v6, %v483_v7 }
 0x1e3   :  { %865 = vmatpush3.bf16.xpose.msk.msra.mxu1 %vm1063_vm4, %v863_v54 }
 0x1e4   :  { %866 = vmatprep.subr.bf16.mxu1 %v908_v11 }
 0x1eb   :  { %869 = vmatpush3.bf16.xpose.msk.msra.mxu1 %vm1063_vm4, %v867_v61 }
 0x1ec   :  { %870 = vmatprep.subr.bf16.mxu1 %v908_v11 }
 0x1f3   :  { %873 = vmatpush3.bf16.xpose.msk.msra.mxu1 %vm1063_vm4, %v871_v4 }
 0x1f4   :  { %874 = vmatprep.subr.bf16.mxu1 %v908_v11 }
 0x1fb   :  { %877 = vmatpush3.bf16.xpose.msk.msra.mxu1 %vm1063_vm4, %v875_v8 }
 0x202   :  { %832 = vmatmul.mubr.msk.f32.vlgmr.msra.gmra.mrb[16].mxu1 %vm496_vm3, %v485_v9 }
 0x2d5   :  { %v614_v16 = vpop.f32.mrb[16].mxu1 }
 0x2d6   :  { %v615_v17 = vadd.f32 %v614_v16, %v495_v15  ;;  %v833_v18 = vpop.f32.mrb[17].mxu1 }
 0x2d8   :  { %618 = vst [vmem:[#allocation3] sm:$0x1] %v615_v17 }
 0x2d9   :  { %895 = shalt.err (!%p892_p4)
}
 0x2da   :  { %s896_s27 = scalar_lea.hbm %s1113_s7, 16 }
 0x2db   :  { %p897_p5 = scmp.ne.s32.totalorder %s1113_s7, %s896_s27  ;;  %p900_p6 = scmp.lt.u32.totalorder %s896_s27, %s1113_s7 }
 0x2dd   :  { %p902_p7 = pnand %p900_p6, %p897_p5 }
 0x2df   :  { %905 = shalt.err (!%p902_p7)
}
 0x2e0   :  { %628 = dma.vmem_to_hbm [thread:$0]  %s626_s23, 16, %s1113_s7, [#allocation4]  }
 0x2e1   :  { %906 = dma.done.wait [#allocation4], 16  }
 0x2e2   :  { %907 = vsyncadd [#allocation4], 4294967280 }
 0x2e3   :  { %632 = vsyncpa [#allocation4], 1 }

</bundles_post_ra>
